<compile_context>
chip_gen: v7x
topology: tpu7x:2x2x1
jax: 0.10.0
libtpu: 0.0.40
codegen_flags: <defaults>
</compile_context>

<pallas_src>
import jax
import jax.numpy as jnp
from jax import lax
from jax.experimental import pallas as pl
from jax.experimental.pallas import tpu as pltpu


def _round_up(x: int, m: int) -> int:
    return (x + m - 1) // m * m


def _min_sublane(dtype) -> int:
    # f32 -> 8, bf16 -> 16, int8/fp8 -> 32 (sub-32-bit dtypes pack along sublanes).
    return max(8, 32 // jnp.dtype(dtype).itemsize)


def _dense_relu_kernel_single_k(x_ref, w_ref, b_ref, o_ref):
    # x_ref: (tm, tk), w_ref: (tn, tk) in native (out, in) layout,
    # contraction on the shared last (lane) axis -> MXU, no XLU transpose.
    y = lax.dot_general(
        x_ref[...], w_ref[...],
        dimension_numbers=(((1,), (1,)), ((), ())),
        preferred_element_type=jnp.float32,
    )
    y = y + b_ref[...].astype(jnp.float32)
    o_ref[...] = jnp.maximum(y, 0.0).astype(o_ref.dtype)


def _dense_relu_kernel_multi_k(x_ref, w_ref, b_ref, o_ref, acc_ref):
    k = pl.program_id(2)
    partial = lax.dot_general(
        x_ref[...], w_ref[...],
        dimension_numbers=(((1,), (1,)), ((), ())),
        preferred_element_type=jnp.float32,
    )

    @pl.when(k == 0)
    def _first():
        acc_ref[...] = partial          # first-step assign: no zero-fill store pass

    @pl.when(k > 0)
    def _accum():
        acc_ref[...] += partial

    @pl.when(k == pl.num_programs(2) - 1)
    def _finalize():
        y = acc_ref[...] + b_ref[...].astype(jnp.float32)
        o_ref[...] = jnp.maximum(y, 0.0).astype(o_ref.dtype)


def dense_layer_forward(x, weight, bias, *, tm=512, tn=512, tk=2048, mxu_dtype=None):
    """Pallas equivalent of DenseLayer.forward: relu(x @ W.T + b)."""
    B, IN = x.shape
    OUT, IN_w = weight.shape
    assert IN == IN_w, "weight/in_features mismatch"
    out_dtype = x.dtype

    # Optional low-precision MXU path (f32 accumulation is kept in the kernel).
    if mxu_dtype is not None and jnp.dtype(mxu_dtype) != jnp.dtype(x.dtype):
        x = x.astype(mxu_dtype)
        weight = weight.astype(mxu_dtype)

    in_itemsize = jnp.dtype(x.dtype).itemsize
    out_itemsize = jnp.dtype(out_dtype).itemsize
    sub = _min_sublane(x.dtype)

    # Generation-aware VMEM budget (v5e/v6e: 128 MiB physical, v7x: 64 MiB).
    try:
        vmem_cap = int(getattr(pltpu.get_tpu_info(), "vmem_capacity_bytes",
                               64 * 1024 * 1024))
    except Exception:
        vmem_cap = 64 * 1024 * 1024
    vmem_budget = int(vmem_cap * 0.85)

    # Clamp tiles: lane axes (N, K) multiples of 128, M multiple of the
    # dtype-dependent sublane tile; never larger than the padded problem.
    tm = min(tm, _round_up(B, sub))
    tn = min(tn, _round_up(OUT, 128))
    tk = min(tk, _round_up(IN, 128))

    def vmem_need(tm_, tn_, tk_):
        need = 2 * (tm_ * tk_ + tn_ * tk_ + tn_) * in_itemsize   # double-buffered inputs
        need += 2 * tm_ * tn_ * out_itemsize                     # double-buffered output
        need += tm_ * tn_ * 4                                    # f32 accumulator
        return need

    # Shrink (K first, then N, then M) only if we exceed the per-generation budget.
    while vmem_need(tm, tn, tk) > vmem_budget:
        if tk > 512:
            tk //= 2
        elif tn > 256:
            tn //= 2
        elif tm > 256:
            tm //= 2
        else:
            break

    # v7x megacore: if both parallel axes collapse to one block, try splitting N
    # so the two TensorCores both get work (no-op on single-TC v5e/v6e).
    if (_round_up(B, tm) // tm == 1 and _round_up(OUT, tn) // tn == 1
            and tn % 256 == 0):
        tn //= 2

    Mp = _round_up(B, tm)
    Np = _round_up(OUT, tn)
    Kp = _round_up(IN, tk)
    m_blocks, n_blocks, k_blocks = Mp // tm, Np // tn, Kp // tk

    # Pad only when necessary; weight keeps its (OUT, IN) layout (no transpose).
    x_p = x if (Mp, Kp) == (B, IN) else (
        jnp.zeros((Mp, Kp), dtype=x.dtype).at[:B, :IN].set(x))
    w_p = weight if (Np, Kp) == (OUT, IN) else (
        jnp.zeros((Np, Kp), dtype=weight.dtype).at[:OUT, :IN].set(weight))
    b_2d = bias.reshape(1, OUT)
    b_p = b_2d if Np == OUT else (
        jnp.zeros((1, Np), dtype=bias.dtype).at[:, :OUT].set(b_2d))

    flops = 2 * Mp * Np * Kp
    bytes_accessed = (
        Mp * Kp * in_itemsize * n_blocks        # x re-read once per N block
        + Np * Kp * in_itemsize * m_blocks      # weight re-read once per M block
        + Np * jnp.dtype(bias.dtype).itemsize
        + Mp * Np * out_itemsize
    )
    vmem_limit = int(min(max(2 * vmem_need(tm, tn, tk), 32 * 1024 * 1024),
                         vmem_budget))

    if k_blocks == 1:
        # Single K step: fused dot + bias + ReLU straight to the output tile,
        # no accumulator scratch, fully parallel 2-D grid.
        kernel = _dense_relu_kernel_single_k
        grid_spec = pltpu.PrefetchScalarGridSpec(
            num_scalar_prefetch=0,
            grid=(m_blocks, n_blocks),
            in_specs=[
                pl.BlockSpec((tm, tk), lambda i, j: (i, 0)),   # activations
                pl.BlockSpec((tn, tk), lambda i, j: (j, 0)),   # weight (OUT, IN)
                pl.BlockSpec((1, tn), lambda i, j: (0, j)),    # bias
            ],
            out_specs=pl.BlockSpec((tm, tn), lambda i, j: (i, j)),
        )
        dim_sem = ("parallel", "parallel")
    else:
        kernel = _dense_relu_kernel_multi_k
        grid_spec = pltpu.PrefetchScalarGridSpec(
            num_scalar_prefetch=0,
            grid=(m_blocks, n_blocks, k_blocks),
            in_specs=[
                pl.BlockSpec((tm, tk), lambda i, j, k: (i, k)),   # activations
                pl.BlockSpec((tn, tk), lambda i, j, k: (j, k)),   # weight (OUT, IN)
                pl.BlockSpec((1, tn), lambda i, j, k: (0, j)),    # bias
            ],
            out_specs=pl.BlockSpec((tm, tn), lambda i, j, k: (i, j)),
            scratch_shapes=[pltpu.VMEM((tm, tn), jnp.float32)],
        )
        dim_sem = ("parallel", "parallel", "arbitrary")

    out_p = pl.pallas_call(
        kernel,
        out_shape=jax.ShapeDtypeStruct((Mp, Np), out_dtype),
        grid_spec=grid_spec,
        compiler_params=pltpu.CompilerParams(
            dimension_semantics=dim_sem,
            vmem_limit_bytes=vmem_limit,
        ),
        cost_estimate=pl.CostEstimate(
            flops=flops, transcendentals=0, bytes_accessed=bytes_accessed
        ),
    )(x_p, w_p, b_p)

    if (Mp, Np) == (B, OUT):
        return out_p
    return out_p[:B, :OUT]


if __name__ == "__main__":
    key = jax.random.PRNGKey(0)
    k_x, k_w, k_b = jax.random.split(key, 3)

    batch = 8
    in_features = 32
    out_features = 64

    # PyTorch Linear shapes: W (out, in), b (out,)
    bound = 1.0 / jnp.sqrt(in_features)
    x = jax.random.normal(k_x, (batch, in_features), dtype=jnp.float32)
    weight = jax.random.uniform(
        k_w, (out_features, in_features), dtype=jnp.float32,
        minval=-bound, maxval=bound)
    bias = jax.random.uniform(
        k_b, (out_features,), dtype=jnp.float32, minval=-bound, maxval=bound)

    out = dense_layer_forward(x, weight, bias)
    out = jax.block_until_ready(out)

    # Plain-JAX reference check: relu(x @ W.T + b)
    ref = jnp.maximum(x @ weight.T + bias, 0.0)
    assert out.shape == (batch, out_features)
    assert jnp.allclose(out, ref, atol=1e-5, rtol=1e-5), "mismatch vs reference"

    # TODO(synk): the PyTorch module declares BatchNorm1d but never applies it
    # in forward(); if the reference module is ever changed to apply bn, this
    # kernel must add that epilogue.
    print("KERNEL_OK")
</pallas_src>

<mosaic_0001>
module attributes {stable_mosaic.version = 11 : i64} {
  func.func @_dense_relu_kernel_single_k(%arg0: i32, %arg1: i32, %arg2: memref<8x128xf32, #tpu.memory_space<vmem>>, %arg3: memref<128x128xf32, #tpu.memory_space<vmem>>, %arg4: memref<1x128xf32, #tpu.memory_space<vmem>>, %arg5: memref<8x128xf32, #tpu.memory_space<vmem>>) attributes {dimension_semantics = [#tpu.dimension_semantics<parallel>, #tpu.dimension_semantics<parallel>], iteration_bounds = array<i64: 1, 1>, scalar_prefetch = 0 : i64, scratch_operands = 0 : i64, tpu.core_type = #tpu.core_type<tc>, window_params = [{transform_indices = @transform_0, window_bounds = array<i64: 8, 128>}, {transform_indices = @transform_1, window_bounds = array<i64: 128, 128>}, {transform_indices = @transform_2, window_bounds = array<i64: 1, 128>}, {transform_indices = @transform_3, window_bounds = array<i64: 8, 128>}]} {
    %c0 = arith.constant 0 : index
    %c0_0 = arith.constant 0 : index
    %0 = vector.load %arg2[%c0, %c0_0] : memref<8x128xf32, #tpu.memory_space<vmem>>, vector<8x128xf32>
    %c0_1 = arith.constant 0 : index
    %c0_2 = arith.constant 0 : index
    %1 = vector.load %arg3[%c0_1, %c0_2] : memref<128x128xf32, #tpu.memory_space<vmem>>, vector<128x128xf32>
    %cst = arith.constant dense<0.000000e+00> : vector<8x128xf32>
    %2 = tpu.matmul %0, %1, %cst {dimension_numbers = #tpu.dot_dimension_numbers<[1], [1], [0], [0], [0, 0, 1, 0], [], []>} : vector<8x128xf32>, vector<128x128xf32>, vector<8x128xf32> -> vector<8x128xf32>
    %c0_3 = arith.constant 0 : index
    %c0_4 = arith.constant 0 : index
    %3 = vector.load %arg4[%c0_3, %c0_4] : memref<1x128xf32, #tpu.memory_space<vmem>>, vector<1x128xf32>
    %4 = vector.broadcast %3 : vector<1x128xf32> to vector<8x128xf32>
    %5 = arith.addf %2, %4 : vector<8x128xf32>
    %cst_5 = arith.constant 0.000000e+00 : f32
    %6 = vector.broadcast %cst_5 : f32 to vector<8x128xf32>
    %7 = arith.maximumf %5, %6 : vector<8x128xf32>
    %c0_6 = arith.constant 0 : index
    %c0_7 = arith.constant 0 : index
    %8 = vector.load %arg5[%c0_6, %c0_7] : memref<8x128xf32, #tpu.memory_space<vmem>>, vector<8x128xf32>
    tpu.vector_store %arg5[%c0_6, %c0_7], %7 {strides = array<i32>} : memref<8x128xf32, #tpu.memory_space<vmem>>, vector<8x128xf32>,
    return
  }
  func.func @transform_0(%arg0: i32, %arg1: i32) -> (i32, i32) {
    %c0_i32 = arith.constant 0 : i32
    %c0_i32_0 = arith.constant 0 : i32
    return %arg0, %c0_i32 : i32, i32
  }
  func.func @transform_1(%arg0: i32, %arg1: i32) -> (i32, i32) {
    %c0_i32 = arith.constant 0 : i32
    %c0_i32_0 = arith.constant 0 : i32
    return %arg1, %c0_i32 : i32, i32
  }
  func.func @transform_2(%arg0: i32, %arg1: i32) -> (i32, i32) {
    %c0_i32 = arith.constant 0 : i32
    %c0_i32_0 = arith.constant 0 : i32
    return %c0_i32, %arg1 : i32, i32
  }
  func.func @transform_3(%arg0: i32, %arg1: i32) -> (i32, i32) {
    %c0_i32 = arith.constant 0 : i32
    return %arg0, %arg1 : i32, i32
  }
}

</mosaic_0001>

<bundles_post_ra>
// kernel: tpu_custom_call.1
= control target key start
LH: loop header
LB: loop body
LE: loop exit
PB: predicated region body
PF: predicated region fallthrough
CT: control target
= control target key end

     0   :  { %8 = vsyncpa [#allocation3], 0  ;;  %s384_s0 = inlined_call_operand.hbm [shape: f32[8,128], index: 0, kind: input, shape index: {}]   ;;  %s385_s1 = inlined_call_operand.hbm [shape: f32[128,128], index: 1, kind: input, shape index: {}]   ;;  %s386_s2 = inlined_call_operand.vmem [shape: f32[1,128], index: 2, kind: input, shape index: {}]   ;;  %s387_s3 = inlined_call_operand.hbm [shape: f32[8,128], index: 3, kind: output, shape index: {}]  }
   0x1   :  { %9 = vsyncpa [#allocation6], 0 }
   0x2   :  { %10 = vsyncpa [#allocation4], 0  ;;  %s310_s12 = smov [#allocation2]   ;;  %s311_s14 = smov [#allocation5]  }
   0x3   :  { %s17_s13 = sshll.u32 %s310_s12, 4  ;;  %s26_s15 = sshll.u32 %s311_s14, 4  ;;  %s18_s13 = int_to_ptr.vmem [resolvable:$true] %s17_s13  ;;  %s338_s15 = int_to_ptr.vmem [resolvable:$true] %s26_s15 }
   0x4   :  { %s238_s18 = scalar_lea.hbm %s384_s0, 128 }
   0x5   :  { %p239_p0 = scmp.ne.s32.totalorder %s384_s0, %s238_s18  ;;  %p242_p1 = scmp.lt.u32.totalorder %s238_s18, %s384_s0 }
   0x7   :  { %p244_p2 = pnand %p242_p1, %p239_p0 }
   0x9   :  { %247 = shalt.err (!%p244_p2)
}
   0xa   :  { %s248_s23 = scalar_lea.vmem %s18_s13, 128  ;;  %p253_p4 = scmp.lt.s32.totalorder %s18_s13, %s18_s13 }
   0xb   :  { %p249_p3 = scmp.ne.s32.totalorder %s18_s13, %s248_s23  ;;  %p254_p5 = scmp.lt.s32.totalorder %s248_s23, %s248_s23 }
   0xd   :  { %p255_p6 = por %p254_p5, %p253_p4 }
   0xf   :  { %p256_p7 = pnand %p255_p6, %p249_p3 }
  0x11   :  { %259 = shalt.err (!%p256_p7)
}
  0x12   :  { %20 = dma.hbm_to_vmem [thread:$0]  %s384_s0, 128, %s18_s13, [#allocation3]  }
  0x13   :  { %s260_s28 = scalar_lea.hbm %s385_s1, 2048 }
  0x14   :  { %p261_p8 = scmp.ne.s32.totalorder %s385_s1, %s260_s28  ;;  %p264_p9 = scmp.lt.u32.totalorder %s260_s28, %s385_s1 }
  0x16   :  { %p266_p10 = pnand %p264_p9, %p261_p8 }
  0x18   :  { %269 = shalt.err (!%p266_p10)
}
  0x19   :  { %s270_s6 = scalar_lea.vmem %s338_s15, 2048  ;;  %p275_p12 = scmp.lt.s32.totalorder %s338_s15, %s338_s15 }
  0x1a   :  { %p271_p11 = scmp.ne.s32.totalorder %s338_s15, %s270_s6  ;;  %p276_p13 = scmp.lt.s32.totalorder %s270_s6, %s270_s6 }
  0x1c   :  { %p277_p0 = por %p276_p13, %p275_p12 }
  0x1e   :  { %p278_p1 = pnand %p277_p0, %p271_p11 }
  0x20   :  { %281 = shalt.err (!%p278_p1)
}
  0x21   :  { %s312_s0 = smov 128   ;;  %s313_s7 = smov 8  }
  0x22   :  { %32 = dma.hbm_to_vmem [thread:$0]  %s385_s1, 2048, %s338_s15, [#allocation6], %s312_s0, %s312_s0, %s313_s7  }
  0x23   :  { %304 = dma.done.wait [#allocation3], 128  }
  0x24   :  { %305 = vsyncadd [#allocation3], 4294967168 }
  0x25   :  { %306 = dma.done.wait [#allocation6], 2048  }
  0x26   :  { %307 = vsyncadd [#allocation6], 4294965248  ;;  %v314_v0 = vmov 0.0|0.0   ;;  %vm315_vm0 = vmmov 0   ;;  %v316_v1 = vmov 0.0   ;;  %v42_v2 = vld [vmem:[#allocation5] sm:$0xff] }
  0x27   :  { %206 = vmatprep.subr.bf16.mxu0 %v314_v0  ;;  %203 = vmatprep.mubr.msk.f32.mxu0 %vm315_vm0, %v316_v1  ;;  %v43_v3 = vld [vmem:[#allocation5 + $0x8] sm:$0xff]  ;;  %v44_v5 = vld [vmem:[#allocation5 + $0x10] sm:$0xff]  ;;  %v45_v6 = vld [vmem:[#allocation5 + $0x18] sm:$0xff]  ;;  %s317_s11 = smov [#allocation7]  }
  0x28   :  { %v207_v4 = vpack.c.bf16 %v43_v3, %v42_v2  ;;  %v210_v7 = vpack.c.bf16 %v45_v6, %v44_v5  ;;  %v46_v8 = vld [vmem:[#allocation5 + $0x20] sm:$0xff]  ;;  %v47_v9 = vld [vmem:[#allocation5 + $0x28] sm:$0xff]  ;;  %v48_v11 = vld [vmem:[#allocation5 + $0x30] sm:$0xff]  ;;  %s143_s12 = sshll.u32 %s317_s11, 4  ;;  %s144_s12 = int_to_ptr.vmem [resolvable:$true] %s143_s12 }
  0x29   :  { %v213_v10 = vpack.c.bf16 %v47_v9, %v46_v8  ;;  %v49_v12 = vld [vmem:[#allocation5 + $0x38] sm:$0xff]  ;;  %v50_v14 = vld [vmem:[#allocation5 + $0x40] sm:$0xff]  ;;  %v51_v15 = vld [vmem:[#allocation5 + $0x48] sm:$0xff]  ;;  %s282_s13 = scalar_lea.vmem %s144_s12, 128  ;;  %p287_p3 = scmp.lt.s32.totalorder %s144_s12, %s144_s12 }
  0x2a   :  { %208 = vmatpush3.bf16.xpose.msra.mxu0 %v207_v4  ;;  %v216_v13 = vpack.c.bf16 %v49_v12, %v48_v11  ;;  %v219_v16 = vpack.c.bf16 %v51_v15, %v50_v14  ;;  %v52_v17 = vld [vmem:[#allocation5 + $0x50] sm:$0xff]  ;;  %v53_v18 = vld [vmem:[#allocation5 + $0x58] sm:$0xff]  ;;  %v54_v20 = vld [vmem:[#allocation5 + $0x60] sm:$0xff]  ;;  %p283_p2 = scmp.ne.s32.totalorder %s144_s12, %s282_s13  ;;  %p288_p4 = scmp.lt.s32.totalorder %s282_s13, %s282_s13 }
  0x2b   :  { %209 = vmatprep.subr.bf16.mxu0 %v314_v0  ;;  %v222_v19 = vpack.c.bf16 %v53_v18, %v52_v17  ;;  %v55_v21 = vld [vmem:[#allocation5 + $0x68] sm:$0xff]  ;;  %v56_v23 = vld [vmem:[#allocation5 + $0x70] sm:$0xff]  ;;  %v57_v24 = vld [vmem:[#allocation5 + $0x78] sm:$0xff] }
  0x2c   :  { %v225_v22 = vpack.c.bf16 %v55_v21, %v54_v20  ;;  %v228_v25 = vpack.c.bf16 %v57_v24, %v56_v23  ;;  %v41_v26 = vld [vmem:[#allocation2] sm:$0xff]  ;;  %p289_p5 = por %p288_p4, %p287_p3 }
  0x2d   :  { %v153_v27 = vld [vmem:[%s386_s2] ss:$0 sm:$0xff] }
  0x2e   :  { %p290_p6 = pnand %p289_p5, %p283_p2 }
  0x32   :  { %211 = vmatpush3.bf16.xpose.msra.mxu0 %v210_v7 }
  0x33   :  { %212 = vmatprep.subr.bf16.mxu0 %v314_v0 }
  0x3a   :  { %214 = vmatpush3.bf16.xpose.msra.mxu0 %v213_v10 }
  0x3b   :  { %215 = vmatprep.subr.bf16.mxu0 %v314_v0 }
  0x42   :  { %217 = vmatpush3.bf16.xpose.msra.mxu0 %v216_v13 }
  0x43   :  { %218 = vmatprep.subr.bf16.mxu0 %v314_v0 }
  0x4a   :  { %220 = vmatpush3.bf16.xpose.msra.mxu0 %v219_v16 }
  0x4b   :  { %221 = vmatprep.subr.bf16.mxu0 %v314_v0 }
  0x52   :  { %223 = vmatpush3.bf16.xpose.msra.mxu0 %v222_v19 }
  0x53   :  { %224 = vmatprep.subr.bf16.mxu0 %v314_v0 }
  0x5a   :  { %226 = vmatpush3.bf16.xpose.msra.mxu0 %v225_v22 }
  0x5b   :  { %227 = vmatprep.subr.bf16.mxu0 %v314_v0 }
  0x62   :  { %229 = vmatpush3.bf16.xpose.msra.mxu0 %v228_v25 }
  0x69   :  { %204 = vmatmul.mubr.f32.vlgmr.msra.gmra.mrb[0].mxu0 %v41_v26 }
 0x13c   :  { %v131_v28 = vpop.f32.mrb[0].mxu0 }
 0x13d   :  { %v132_v29 = vadd.f32 %v153_v27, %v131_v28  ;;  %v205_v30 = vpop.f32.mrb[1].mxu0 }
 0x13f   :  { %v135_v31 = vmax.f32 %v132_v29, 0.0 }
 0x141   :  { %136 = vst [vmem:[#allocation7] sm:$0xff] %v135_v31 }
 0x142   :  { %293 = shalt.err (!%p290_p6)
}
 0x143   :  { %s294_s16 = scalar_lea.hbm %s387_s3, 128 }
 0x144   :  { %p295_p7 = scmp.ne.s32.totalorder %s387_s3, %s294_s16  ;;  %p298_p8 = scmp.lt.u32.totalorder %s294_s16, %s387_s3 }
 0x146   :  { %p300_p9 = pnand %p298_p8, %p295_p7 }
 0x148   :  { %303 = shalt.err (!%p300_p9)
}
 0x149   :  { %146 = dma.vmem_to_hbm [thread:$0]  %s144_s12, 128, %s387_s3, [#allocation4]  }
 0x14a   :  { %308 = dma.done.wait [#allocation4], 128  }
 0x14b   :  { %309 = vsyncadd [#allocation4], 4294967168 }
 0x14c   :  { %150 = vsyncpa [#allocation3], 1 }
 0x14d   :  { %151 = vsyncpa [#allocation6], 1 }
 0x14e   :  { %152 = vsyncpa [#allocation4], 1 }

</bundles_post_ra>
